<compile_context>
chip_gen: v6e
topology: v6e:2x2x1
jax: 0.10.0
libtpu: 0.0.40
codegen_flags: <defaults>
</compile_context>

<pallas_src>
import functools
import math

import jax
import jax.numpy as jnp
from jax.experimental import pallas as pl
from jax.experimental.pallas import tpu as pltpu


# ----------------------------------------------------------------------------
# Chip detection / tiling configuration
# ----------------------------------------------------------------------------
@functools.lru_cache(maxsize=None)
def _tpu_generation():
    try:
        kind = jax.devices()[0].device_kind.lower()
    except Exception:
        return "unknown"
    if "v6" in kind:
        return "v6e"
    if "v7" in kind or "7x" in kind:
        return "v7x"
    if "v5 lite" in kind or "v5e" in kind or "v5lite" in kind:
        return "v5e"
    return "unknown"


def _attn_tiles():
    # v6e/v7x MXU is 2x256x256 -> 256 tiles fill it; v5e (4x128x128, HBM-bound,
    # 16 MiB scoped VMEM default) and unknown chips keep the conservative 128.
    if _tpu_generation() in ("v6e", "v7x"):
        return 256, 256
    return 128, 128


def _linear_tiles():
    if _tpu_generation() in ("v6e", "v7x"):
        return 512, 512, 512
    return 256, 256, 512


def _vmem_limit_bytes():
    gen = _tpu_generation()
    if gen == "v6e":
        return 96 * 1024 * 1024     # 128 MiB physical VMEM
    if gen == "v7x":
        return 48 * 1024 * 1024     # 64 MiB physical VMEM -> re-derived, keep headroom
    return None                     # v5e / unknown: stay within default scoped limit


def _pick_tile(dim, target):
    """Use the requested tile if it divides `dim`, else fall back to the full dim.

    Full-dim blocks always satisfy the (8,128) block-shape rule; the targets
    themselves (multiples of 128/256/512) satisfy it too.
    """
    if dim <= target:
        return dim
    if dim % target == 0:
        return target
    return dim


# ----------------------------------------------------------------------------
# Tiled matmul + bias kernel (QKV projection and output projection)
# ----------------------------------------------------------------------------
def _matmul_bias_kernel(x_ref, w_ref, b_ref, o_ref, acc_ref):
    k = pl.program_id(2)

    @pl.when(k == 0)
    def _():
        acc_ref[...] = jnp.zeros_like(acc_ref)

    # x/w arrive already in the MXU dtype (bf16 by default); accumulate in f32.
    acc_ref[...] += jnp.dot(x_ref[...], w_ref[...],
                            preferred_element_type=jnp.float32)

    @pl.when(k == pl.num_programs(2) - 1)
    def _():
        o_ref[...] = (acc_ref[...] + b_ref[...]).astype(o_ref.dtype)


def linear(x, w, b, *, tm=None, tn=None, tk=None):
    """y = x @ w + b.  x and w should already be the MXU dtype (bf16 recommended);
    accumulation + bias add are f32, output is f32."""
    M, K = x.shape
    K2, N = w.shape
    assert K == K2
    dtm, dtn, dtk = _linear_tiles()
    tm = _pick_tile(M, tm or dtm)
    tn = _pick_tile(N, tn or dtn)
    tk = _pick_tile(K, tk or dtk)
    grid = (M // tm, N // tn, K // tk)

    cost = pl.CostEstimate(
        flops=2 * M * N * K,
        transcendentals=0,
        bytes_accessed=int(x.dtype.itemsize * M * K + w.dtype.itemsize * K * N
                           + 4 * (M * N + N)),
    )
    return pl.pallas_call(
        _matmul_bias_kernel,
        out_shape=jax.ShapeDtypeStruct((M, N), jnp.float32),
        grid_spec=pltpu.PrefetchScalarGridSpec(
            num_scalar_prefetch=0,
            grid=grid,
            in_specs=[
                pl.BlockSpec((tm, tk), lambda i, j, k: (i, k)),
                pl.BlockSpec((tk, tn), lambda i, j, k: (k, j)),
                pl.BlockSpec((1, tn), lambda i, j, k: (0, j)),
            ],
            out_specs=pl.BlockSpec((tm, tn), lambda i, j, k: (i, j)),
            scratch_shapes=[pltpu.VMEM((tm, tn), jnp.float32)],
        ),
        compiler_params=pltpu.CompilerParams(
            dimension_semantics=("parallel", "parallel", "arbitrary"),
            vmem_limit_bytes=_vmem_limit_bytes()),
        cost_estimate=cost,
    )(x, w, b.reshape(1, N).astype(jnp.float32))


# ----------------------------------------------------------------------------
# Flash-style attention kernel: grid (B, Sq tiles, Sk tiles), all heads per step
# ----------------------------------------------------------------------------
def _flash_attn_kernel(*refs, has_mask):
    if has_mask:
        (q_ref, k_ref, v_ref, mask_ref,
         ctx_ref, s0_ref, m0_ref, l0_ref, m_sc, l_sc, acc_sc) = refs
    else:
        (q_ref, k_ref, v_ref,
         ctx_ref, s0_ref, m0_ref, l0_ref, m_sc, l_sc, acc_sc) = refs

    ki = pl.program_id(2)

    @pl.when(ki == 0)
    def _():
        m_sc[...] = jnp.full_like(m_sc, -jnp.inf)
        l_sc[...] = jnp.zeros_like(l_sc)
        acc_sc[...] = jnp.zeros_like(acc_sc)

    q = q_ref[0]                             # [H, tq, Dh]  (1/sqrt(Dh) folded into wq)
    k = k_ref[0]                             # [H, tk, Dh]
    v = v_ref[0]                             # [H, tk, Dh]

    s = jnp.einsum("hqd,hkd->hqk", q, k,
                   preferred_element_type=jnp.float32)       # [H, tq, tk] f32

    if has_mask:
        # int8 mask -> one [tq, tk] additive bias, broadcast over heads.
        bias = jnp.where(mask_ref[0] != 0, jnp.float32(-1e18), jnp.float32(0.0))
        s = s + bias[None, :, :]

    # Only head 0 is consumed downstream: write its raw (scaled, masked) scores.
    s0_ref[0] = s[0]

    # Online softmax; statistics stay f32 (v5e has no bf16 VPU/EUP).
    m_prev = m_sc[...]                                        # [H, tq, 1]
    m_new = jnp.maximum(m_prev, jnp.max(s, axis=-1, keepdims=True))
    alpha = jnp.exp(m_prev - m_new)
    p = jnp.exp(s - m_new)                                    # [H, tq, tk] f32
    l_sc[...] = alpha * l_sc[...] + jnp.sum(p, axis=-1, keepdims=True)
    acc_sc[...] = alpha * acc_sc[...] + jnp.einsum(
        "hqk,hkd->hqd", p.astype(v.dtype), v, preferred_element_type=jnp.float32)
    m_sc[...] = m_new
    # TODO(synk): on v6e/v7x a bf16 exp (EUP bf16) could remove the p->bf16 cast; kept
    # f32 so the l accumulation stays accurate on every generation.

    @pl.when(ki == pl.num_programs(2) - 1)
    def _():
        inv_l = pl.reciprocal(l_sc[...], approx=True)          # EUP, once per Sq tile
        ctx_ref[0] = (acc_sc[...] * inv_l).astype(ctx_ref.dtype)
        m0_ref[0] = m_sc[0]                                    # head-0 stats for the
        l0_ref[0] = l_sc[0]                                    # tiled top_attn pass


def flash_attention(q_up, k_up, v_up, mask=None, *, tq=None, tk=None):
    """q_up:[B,H,Sq,Dh], k_up/v_up:[B,H,Sk,Dh] (MXU dtype), mask:[B,Sq,Sk] nonzero=masked.

    Returns (ctx [B,H,Sq,Dh] f32, head-0 raw scores [B,Sq,Sk] f32,
             head-0 running max [B,Sq,1], head-0 softmax denom [B,Sq,1]).
    """
    B, H, Sq, Dh = q_up.shape
    Sk = k_up.shape[2]
    dtq, dtk = _attn_tiles()
    tq = _pick_tile(Sq, tq or dtq)
    tk = _pick_tile(Sk, tk or dtk)
    grid = (B, Sq // tq, Sk // tk)
    has_mask = mask is not None

    in_specs = [
        pl.BlockSpec((1, H, tq, Dh), lambda b, qi, ki: (b, 0, qi, 0)),
        pl.BlockSpec((1, H, tk, Dh), lambda b, qi, ki: (b, 0, ki, 0)),
        pl.BlockSpec((1, H, tk, Dh), lambda b, qi, ki: (b, 0, ki, 0)),
    ]
    args = [q_up, k_up, v_up]
    if has_mask:
        in_specs.append(pl.BlockSpec((1, tq, tk), lambda b, qi, ki: (b, qi, ki)))
        args.append(mask.astype(jnp.int8))          # int8: quarter the mask DMA bytes
    # TODO(synk): for causal masks a scalar-prefetched block-validity table could gate
    # the QK^T/softmax work per (qi,ki) tile (~2x on decoder masks); not implemented.

    esz = q_up.dtype.itemsize
    bytes_accessed = (esz * (q_up.size + (Sq // tq) * (k_up.size + v_up.size))
                      + 4 * (B * H * Sq * Dh + B * Sq * Sk + 2 * B * Sq))
    if has_mask:
        bytes_accessed += B * Sq * Sk
    cost = pl.CostEstimate(
        flops=4 * B * H * Sq * Sk * Dh,
        transcendentals=B * H * Sq * Sk,
        bytes_accessed=int(bytes_accessed),
    )

    kernel = functools.partial(_flash_attn_kernel, has_mask=has_mask)
    ctx, s0, m0, l0 = pl.pallas_call(
        kernel,
        out_shape=(
            jax.ShapeDtypeStruct((B, H, Sq, Dh), jnp.float32),
            jax.ShapeDtypeStruct((B, Sq, Sk), jnp.float32),
            jax.ShapeDtypeStruct((B, Sq, 1), jnp.float32),
            jax.ShapeDtypeStruct((B, Sq, 1), jnp.float32),
        ),
        grid_spec=pltpu.PrefetchScalarGridSpec(
            num_scalar_prefetch=0,
            grid=grid,
            in_specs=in_specs,
            out_specs=(
                pl.BlockSpec((1, H, tq, Dh), lambda b, qi, ki: (b, 0, qi, 0)),
                pl.BlockSpec((1, tq, tk), lambda b, qi, ki: (b, qi, ki)),
                pl.BlockSpec((1, tq, 1), lambda b, qi, ki: (b, qi, 0)),
                pl.BlockSpec((1, tq, 1), lambda b, qi, ki: (b, qi, 0)),
            ),
            scratch_shapes=[
                pltpu.VMEM((H, tq, 1), jnp.float32),     # running max
                pltpu.VMEM((H, tq, 1), jnp.float32),     # running denom
                pltpu.VMEM((H, tq, Dh), jnp.float32),    # running context
            ],
        ),
        compiler_params=pltpu.CompilerParams(
            dimension_semantics=("parallel", "parallel", "arbitrary"),
            vmem_limit_bytes=_vmem_limit_bytes()),
        cost_estimate=cost,
    )(*args)
    return ctx, s0, m0, l0


# ----------------------------------------------------------------------------
# top_attn: elementwise, Sk-tiled normalization of head-0 scores with exported m/l
# ----------------------------------------------------------------------------
def _top_attn_kernel(s_ref, m_ref, l_ref, o_ref):
    inv_l = 1.0 / l_ref[0]                    # exact reciprocal: rows sum to 1
    o_ref[0] = jnp.exp(s_ref[0] - m_ref[0]) * inv_l


def top_attn_softmax(s0, m0, l0, *, tq=None, tk=512):
    B, Sq, Sk = s0.shape
    dtq, _ = _attn_tiles()
    tq = _pick_tile(Sq, tq or dtq)
    tks = _pick_tile(Sk, tk)
    return pl.pallas_call(
        _top_attn_kernel,
        out_shape=jax.ShapeDtypeStruct((B, Sq, Sk), jnp.float32),
        grid=(B, Sq // tq, Sk // tks),
        in_specs=[
            pl.BlockSpec((1, tq, tks), lambda b, qi, ki: (b, qi, ki)),
            pl.BlockSpec((1, tq, 1), lambda b, qi, ki: (b, qi, 0)),
            pl.BlockSpec((1, tq, 1), lambda b, qi, ki: (b, qi, 0)),
        ],
        out_specs=pl.BlockSpec((1, tq, tks), lambda b, qi, ki: (b, qi, ki)),
        compiler_params=pltpu.CompilerParams(
            dimension_semantics=("parallel", "parallel", "parallel")),
    )(s0, m0, l0)


# ----------------------------------------------------------------------------
# Module wrapper (mirrors MultiHeadedAttention.forward)
# ----------------------------------------------------------------------------
def init_params(key, model_dim, head_count, dim_per_head):
    hd = head_count * dim_per_head
    ks = jax.random.split(key, 8)
    s_in = 1.0 / math.sqrt(model_dim)
    s_hd = 1.0 / math.sqrt(hd)
    return {
        "wk": jax.random.uniform(ks[0], (model_dim, hd), jnp.float32, -s_in, s_in),
        "bk": jax.random.uniform(ks[1], (hd,), jnp.float32, -s_in, s_in),
        "wv": jax.random.uniform(ks[2], (model_dim, hd), jnp.float32, -s_in, s_in),
        "bv": jax.random.uniform(ks[3], (hd,), jnp.float32, -s_in, s_in),
        "wq": jax.random.uniform(ks[4], (model_dim, hd), jnp.float32, -s_in, s_in),
        "bq": jax.random.uniform(ks[5], (hd,), jnp.float32, -s_in, s_in),
        "wo": jax.random.uniform(ks[6], (hd, model_dim), jnp.float32, -s_hd, s_hd),
        "bo": jax.random.uniform(ks[7], (model_dim,), jnp.float32, -s_hd, s_hd),
    }


def prepare_params(params, head_count, dim_per_head, compute_dtype=jnp.bfloat16):
    """One-time derivation of kernel-ready weights (hoisted out of the forward):
       * fused [wk|wv|wq] QKV weight for the self-attention path,
       * 1/sqrt(Dh) query scale folded into wq / bq,
       * MXU-dtype (bf16) weight copies; biases stay f32 (added after f32 accumulation).
    """
    scale = 1.0 / math.sqrt(dim_per_head)
    wq_s = params["wq"] * scale
    bq_s = params["bq"] * scale
    return {
        "w_qkv": jnp.concatenate([params["wk"], params["wv"], wq_s],
                                 axis=1).astype(compute_dtype),
        "b_qkv": jnp.concatenate([params["bk"], params["bv"], bq_s], axis=0),
        "wk": params["wk"].astype(compute_dtype), "bk": params["bk"],
        "wv": params["wv"].astype(compute_dtype), "bv": params["bv"],
        "wq": wq_s.astype(compute_dtype), "bq": bq_s,
        "wo": params["wo"].astype(compute_dtype), "bo": params["bo"],
    }


def split_heads(x, head_count, dim_per_head):
    # [B, S, H*Dh] -> [B, H, S, Dh]
    B, S, _ = x.shape
    return x.reshape(B, S, head_count, dim_per_head).transpose(0, 2, 1, 3)


def combine_heads(x):
    # [B, H, S, Dh] -> [B, S, H*Dh]
    B, H, S, Dh = x.shape
    return x.transpose(0, 2, 1, 3).reshape(B, S, H * Dh)


def multi_headed_attention(prep, key, value, query, head_count, dim_per_head,
                           mask=None, compute_dtype=jnp.bfloat16):
    B, Sk, D = key.shape
    Sq = query.shape[1]
    hd = head_count * dim_per_head

    if key is value and value is query:
        # Self-attention fast path (gated on Python object identity): one fused QKV
        # projection; a single reshape+transpose splits k/v/q heads (no hd slices).
        x = key.reshape(B * Sk, D).astype(compute_dtype)
        kvq = linear(x, prep["w_qkv"], prep["b_qkv"])            # [B*S, 3*hd] f32
        kvq = kvq.reshape(B, Sk, 3, head_count, dim_per_head)
        kvq = kvq.transpose(2, 0, 3, 1, 4)                       # [3, B, H, S, Dh]
        key_up, value_up, query_up = kvq[0], kvq[1], kvq[2]
    else:
        xk = key.reshape(B * Sk, D).astype(compute_dtype)
        xv = value.reshape(B * Sk, D).astype(compute_dtype)
        xq = query.reshape(B * Sq, D).astype(compute_dtype)
        key_up = split_heads(linear(xk, prep["wk"], prep["bk"]).reshape(B, Sk, hd),
                             head_count, dim_per_head)
        value_up = split_heads(linear(xv, prep["wv"], prep["bv"]).reshape(B, Sk, hd),
                               head_count, dim_per_head)
        query_up = split_heads(linear(xq, prep["wq"], prep["bq"]).reshape(B, Sq, hd),
                               head_count, dim_per_head)

    # query_up already carries the 1/sqrt(Dh) scale (folded into wq/bq).
    # Pre-cast the head tensors to the MXU dtype outside the kernel (halves K/V DMA).
    ctx, s0, m0, l0 = flash_attention(query_up.astype(compute_dtype),
                                      key_up.astype(compute_dtype),
                                      value_up.astype(compute_dtype),
                                      mask)

    # TODO(synk): nn.Dropout on the attention probabilities is identity here
    # (eval-mode semantics).
    top_attn = top_attn_softmax(s0, m0, l0)                   # [B, Sq, Sk]

    # TODO(synk): ctx is still combined in XLA ([B,H,Sq,Dh]->[B,Sq,H*Dh]); folding this
    # transpose into the flash kernel's final store requires a sublane relayout that is
    # fragile for Dh < 128, so it is intentionally left outside the kernel.
    context = combine_heads(ctx)                               # [B, Sq, H*Dh] f32
    output = linear(context.reshape(B * Sq, hd).astype(compute_dtype),
                    prep["wo"], prep["bo"]).reshape(B, Sq, D)

    # TODO(synk): enc_attn_cache / self_attn_cache concatenation paths are not
    # implemented (not exercised by this forward).
    return output, top_attn, [key_up, value_up]


# ----------------------------------------------------------------------------
# Pure-JAX (f32) reference for a correctness check
# ----------------------------------------------------------------------------
def reference(params, key, value, query, head_count, dim_per_head, mask=None):
    k_up = split_heads(key @ params["wk"] + params["bk"], head_count, dim_per_head)
    v_up = split_heads(value @ params["wv"] + params["bv"], head_count, dim_per_head)
    q_up = split_heads(query @ params["wq"] + params["bq"], head_count, dim_per_head)
    q_up = q_up / math.sqrt(dim_per_head)
    scores = jnp.einsum("bhqd,bhkd->bhqk", q_up, k_up)
    if mask is not None:
        scores = jnp.where(mask[:, None, :, :].astype(bool), -1e18, scores)
    attn = jax.nn.softmax(scores, axis=-1)
    ctx = jnp.einsum("bhqk,bhkd->bhqd", attn, v_up)
    out = combine_heads(ctx) @ params["wo"] + params["bo"]
    return out, attn[:, 0, :, :], [k_up, v_up]


if __name__ == "__main__":
    B, S, D, H = 2, 8, 32, 4
    Dh = D // H

    root = jax.random.PRNGKey(0)
    k_p, k_k, k_v, k_q = jax.random.split(root, 4)
    params = init_params(k_p, D, H, Dh)
    prep = prepare_params(params, H, Dh)                 # bf16 MXU weights (default)

    key_in = jax.random.normal(k_k, (B, S, D), jnp.float32)
    value_in = jax.random.normal(k_v, (B, S, D), jnp.float32)
    query_in = jax.random.normal(k_q, (B, S, D), jnp.float32)

    # bf16 matmuls vs f32 reference -> relaxed tolerances.
    TOL = dict(atol=5e-2, rtol=5e-2)

    # --- case 1: cross-attention style (distinct K/V/Q), no mask ----------------
    out, top_attn, (key_up, value_up) = multi_headed_attention(
        prep, key_in, value_in, query_in, H, Dh, mask=None)
    jax.block_until_ready((out, top_attn, key_up, value_up))

    ref_out, ref_top, (ref_k, ref_v) = reference(
        params, key_in, value_in, query_in, H, Dh, mask=None)
    assert jnp.allclose(out, ref_out, **TOL)
    assert jnp.allclose(top_attn, ref_top, **TOL)
    assert jnp.allclose(key_up, ref_k, **TOL)
    assert jnp.allclose(value_up, ref_v, **TOL)

    # --- case 2: self-attention (fused QKV projection) with a causal mask -------
    causal = jnp.arange(S)[None, :] > jnp.arange(S)[:, None]   # True == masked out
    mask = jnp.broadcast_to(causal, (B, S, S))

    out2, top2, (k2, v2) = multi_headed_attention(
        prep, key_in, key_in, key_in, H, Dh, mask=mask)
    jax.block_until_ready((out2, top2, k2, v2))

    ref_out2, ref_top2, (ref_k2, ref_v2) = reference(
        params, key_in, key_in, key_in, H, Dh, mask=mask)
    assert jnp.allclose(out2, ref_out2, **TOL)
    assert jnp.allclose(top2, ref_top2, **TOL)
    assert jnp.allclose(k2, ref_k2, **TOL)
    assert jnp.allclose(v2, ref_v2, **TOL)

    print("KERNEL_OK")
</pallas_src>

<mosaic_0001>
module attributes {stable_mosaic.version = 11 : i64} {
  func.func @_matmul_bias_kernel(%arg0: i32, %arg1: i32, %arg2: i32, %arg3: memref<16x32xbf16, #tpu.memory_space<vmem>>, %arg4: memref<32x32xbf16, #tpu.memory_space<vmem>>, %arg5: memref<1x32xf32, #tpu.memory_space<vmem>>, %arg6: memref<16x32xf32, #tpu.memory_space<vmem>>, %arg7: memref<16x32xf32, #tpu.memory_space<vmem>>) attributes {dimension_semantics = [#tpu.dimension_semantics<parallel>, #tpu.dimension_semantics<parallel>, #tpu.dimension_semantics<arbitrary>], iteration_bounds = array<i64: 1, 1, 1>, scalar_prefetch = 0 : i64, scratch_operands = 1 : i64, tpu.core_type = #tpu.core_type<tc>, window_params = [{transform_indices = @transform_0, window_bounds = array<i64: 16, 32>}, {transform_indices = @transform_1, window_bounds = array<i64: 32, 32>}, {transform_indices = @transform_2, window_bounds = array<i64: 1, 32>}, {transform_indices = @transform_3, window_bounds = array<i64: 16, 32>}]} {
    %c0_i32 = arith.constant 0 : i32
    %0 = arith.cmpi eq, %arg2, %c0_i32 : i32
    %1 = arith.extui %0 : i1 to i32
    %c0_i32_0 = arith.constant 0 : i32
    %2 = arith.cmpi ne, %1, %c0_i32_0 : i32
    scf.if %2 {
      %cst_10 = arith.constant 0.000000e+00 : f32
      %12 = vector.broadcast %cst_10 : f32 to vector<16x32xf32>
      %c0_11 = arith.constant 0 : index
      %c0_12 = arith.constant 0 : index
      %13 = vector.load %arg7[%c0_11, %c0_12] : memref<16x32xf32, #tpu.memory_space<vmem>>, vector<16x32xf32>
      tpu.vector_store %arg7[%c0_11, %c0_12], %12 {strides = array<i32>} : memref<16x32xf32, #tpu.memory_space<vmem>>, vector<16x32xf32>,
    } else {
    }
    %c0 = arith.constant 0 : index
    %c0_1 = arith.constant 0 : index
    %3 = vector.load %arg7[%c0, %c0_1] : memref<16x32xf32, #tpu.memory_space<vmem>>, vector<16x32xf32>
    %c0_2 = arith.constant 0 : index
    %c0_3 = arith.constant 0 : index
    %4 = vector.load %arg3[%c0_2, %c0_3] : memref<16x32xbf16, #tpu.memory_space<vmem>>, vector<16x32xbf16>
    %c0_4 = arith.constant 0 : index
    %c0_5 = arith.constant 0 : index
    %5 = vector.load %arg4[%c0_4, %c0_5] : memref<32x32xbf16, #tpu.memory_space<vmem>>, vector<32x32xbf16>
    %cst = arith.constant dense<0.000000e+00> : vector<16x32xf32>
    %6 = tpu.matmul %4, %5, %cst {dimension_numbers = #tpu.dot_dimension_numbers<[1], [0], [0], [1], [0, 0, 1, 1], [], []>} : vector<16x32xbf16>, vector<32x32xbf16>, vector<16x32xf32> -> vector<16x32xf32>
    %7 = arith.addf %3, %6 : vector<16x32xf32>
    %c0_6 = arith.constant 0 : index
    %c0_7 = arith.constant 0 : index
    %8 = vector.load %arg7[%c0_6, %c0_7] : memref<16x32xf32, #tpu.memory_space<vmem>>, vector<16x32xf32>
    tpu.vector_store %arg7[%c0_6, %c0_7], %7 {strides = array<i32>} : memref<16x32xf32, #tpu.memory_space<vmem>>, vector<16x32xf32>,
    %c0_i32_8 = arith.constant 0 : i32
    %9 = arith.cmpi eq, %arg2, %c0_i32_8 : i32
    %10 = arith.extui %9 : i1 to i32
    %c0_i32_9 = arith.constant 0 : i32
    %11 = arith.cmpi ne, %10, %c0_i32_9 : i32
    scf.if %11 {
      %c0_10 = arith.constant 0 : index
      %c0_11 = arith.constant 0 : index
      %12 = vector.load %arg7[%c0_10, %c0_11] : memref<16x32xf32, #tpu.memory_space<vmem>>, vector<16x32xf32>
      %c0_12 = arith.constant 0 : index
      %c0_13 = arith.constant 0 : index
      %13 = vector.load %arg5[%c0_12, %c0_13] : memref<1x32xf32, #tpu.memory_space<vmem>>, vector<1x32xf32>
      %14 = vector.broadcast %13 : vector<1x32xf32> to vector<16x32xf32>
      %15 = arith.addf %12, %14 : vector<16x32xf32>
      %c0_14 = arith.constant 0 : index
      %c0_15 = arith.constant 0 : index
      %16 = vector.load %arg6[%c0_14, %c0_15] : memref<16x32xf32, #tpu.memory_space<vmem>>, vector<16x32xf32>
      tpu.vector_store %arg6[%c0_14, %c0_15], %15 {strides = array<i32>} : memref<16x32xf32, #tpu.memory_space<vmem>>, vector<16x32xf32>,
    } else {
    }
    return
  }
  func.func @transform_0(%arg0: i32, %arg1: i32, %arg2: i32) -> (i32, i32) {
    %c0_i32 = arith.constant 0 : i32
    return %arg0, %arg2 : i32, i32
  }
  func.func @transform_1(%arg0: i32, %arg1: i32, %arg2: i32) -> (i32, i32) {
    %c0_i32 = arith.constant 0 : i32
    return %arg2, %arg1 : i32, i32
  }
  func.func @transform_2(%arg0: i32, %arg1: i32, %arg2: i32) -> (i32, i32) {
    %c0_i32 = arith.constant 0 : i32
    %c0_i32_0 = arith.constant 0 : i32
    return %c0_i32, %arg1 : i32, i32
  }
  func.func @transform_3(%arg0: i32, %arg1: i32, %arg2: i32) -> (i32, i32) {
    %c0_i32 = arith.constant 0 : i32
    return %arg0, %arg1 : i32, i32
  }
}

</mosaic_0001>

<bundles_post_ra>
// kernel: tpu_custom_call.1
= control target key start
LH: loop header
LB: loop body
LE: loop exit
PB: predicated region body
PF: predicated region fallthrough
CT: control target
= control target key end

     0   :  { %8 = vsyncpa [#allocation4], 0  ;;  %s301_s0 = inlined_call_operand.hbm [shape: bf16[16,32], index: 0, kind: input, shape index: {}]   ;;  %s302_s1 = inlined_call_operand.hbm [shape: bf16[32,32], index: 1, kind: input, shape index: {}]   ;;  %s303_s2 = inlined_call_operand.vmem [shape: f32[1,32], index: 2, kind: input, shape index: {}]   ;;  %s304_s3 = inlined_call_operand.hbm [shape: f32[16,32], index: 3, kind: output, shape index: {}]  }
   0x1   :  { %9 = vsyncpa [#allocation7], 0 }
   0x2   :  { %10 = vsyncpa [#allocation5], 0  ;;  %s253_s12 = smov [#allocation3]  }
   0x3   :  { %s16_s13 = sshll.u32 %s253_s12, 4  ;;  %s17_s13 = int_to_ptr.vmem [resolvable:$true] %s16_s13 }
   0x4   :  { %s195_s14 = scalar_lea.vmem %s17_s13, 128  ;;  %p200_p1 = scmp.lt.s32.totalorder %s17_s13, %s17_s13 }
   0x5   :  { %p196_p0 = scmp.ne.s32.totalorder %s17_s13, %s195_s14  ;;  %p201_p2 = scmp.lt.s32.totalorder %s195_s14, %s195_s14 }
   0x7   :  { %p202_p3 = por %p201_p2, %p200_p1 }
   0x9   :  { %p203_p4 = pnand %p202_p3, %p196_p0 }
   0xb   :  { %206 = shalt.err (!%p203_p4)
}
   0xc   :  { %s254_s15 = smov 64   ;;  %s255_s16 = smov 4  }
   0xd   :  { %22 = dma.hbm_to_vmem [thread:$0]  %s301_s0, 128, %s17_s13, [#allocation4], %s254_s15, %s254_s15, %s255_s16  }
   0xe   :  { %s256_s19 = smov [#allocation6]  }
   0xf   :  { %s28_s20 = sshll.u32 %s256_s19, 4  ;;  %s29_s20 = int_to_ptr.vmem [resolvable:$true] %s28_s20 }
  0x10   :  { %s215_s21 = scalar_lea.vmem %s29_s20, 256  ;;  %p220_p6 = scmp.lt.s32.totalorder %s29_s20, %s29_s20 }
  0x11   :  { %p216_p5 = scmp.ne.s32.totalorder %s29_s20, %s215_s21  ;;  %p221_p7 = scmp.lt.s32.totalorder %s215_s21, %s215_s21 }
  0x13   :  { %p222_p8 = por %p221_p7, %p220_p6 }
  0x15   :  { %p223_p9 = pnand %p222_p8, %p216_p5 }
  0x17   :  { %226 = shalt.err (!%p223_p9)
}
  0x18   :  { %34 = dma.hbm_to_vmem [thread:$0]  %s302_s1, 256, %s29_s20, [#allocation7], %s254_s15, %s254_s15, %s255_s16  }
  0x19   :  { %247 = dma.done.wait [#allocation4], 128  }
  0x1a   :  { %248 = vsyncadd [#allocation4], 4294967168 }
  0x1b   :  { %249 = dma.done.wait [#allocation7], 256  }
  0x1c   :  { %250 = vsyncadd [#allocation7], 4294967040  ;;  %vm48_vm0 = vcmask 261120   ;;  %v257_v0 = vmov 0.0   ;;  %vm258_vm1 = vmmov 0   ;;  %v184_v1 = vld [vmem:[#allocation6 + $0x8] sm:$0xff]  }
  0x1d   :  { %167 = vmatprep.subr.bf16.mxu0 %v257_v0  ;;  %171 = vmatprep.mubr.msk.bf16.mxu0 %vm258_vm1, %v257_v0  ;;  %49 = vst.msk [vmem:[#allocation2] sm:$0xff] %vm48_vm0, %v257_v0  ;;  %50 = vst.msk [vmem:[#allocation2 + $0x8] sm:$0xff] %vm48_vm0, %v257_v0  ;;  %v185_v2 = vld [vmem:[#allocation6] sm:$0xff]   ;;  %v186_v3 = vld [vmem:[#allocation3] sm:$0xff]   ;;  %s259_s24 = smov [#allocation8]  }
  0x1e   :  { %168 = vmatpush3.bf16.msra.mxu0 %v184_v1  ;;  %v163_v12 = vld [vmem:[%s303_s2] ss:$0 sm:$0xff]  ;;  %s146_s25 = sshll.u32 %s259_s24, 4  ;;  %s147_s25 = int_to_ptr.vmem [resolvable:$true] %s146_s25 }
  0x1f   :  { %169 = vmatprep.subr.bf16.mxu0 %v257_v0  ;;  %s227_s26 = scalar_lea.vmem %s147_s25, 256  ;;  %p232_p11 = scmp.lt.s32.totalorder %s147_s25, %s147_s25 }
  0x20   :  { %p228_p10 = scmp.ne.s32.totalorder %s147_s25, %s227_s26  ;;  %p233_p12 = scmp.lt.s32.totalorder %s227_s26, %s227_s26 }
  0x22   :  { %170 = vmatpush3.bf16.msra.mxu0 %v185_v2  ;;  %p234_p13 = por %p233_p12, %p232_p11 }
  0x24   :  { %v51_v4 = vld [vmem:[#allocation2] sm:$0xff]  ;;  %v52_v8 = vld [vmem:[#allocation2 + $0x8] sm:$0xff]  ;;  %p235_p0 = pnand %p234_p13, %p228_p10 }
  0x25   :  { %172 = vmatmul.mubr.msk.bf16.vlgmr.msra.gmra.mxu0 %vm48_vm0, %v186_v3 }
  0xe5   :  { %v114_v5 = vpop.f32.mrf.mxu0 }
  0xe6   :  { %v121_v6 = vadd.f32 %v114_v5, %v51_v4 }
  0xe7   :  { %v173_v7 = vpop.f32.mrf.mxu0 }
  0xe8   :  { %123 = vst.msk [vmem:[#allocation2] sm:$0xff] %vm48_vm0, %v121_v6 }
  0xe9   :  { %v117_v9 = vpop.f32.mrf.mxu0 }
  0xea   :  { %v122_v10 = vadd.f32 %v117_v9, %v52_v8 }
  0xeb   :  { %v174_v11 = vpop.f32.mrf.mxu0 }
  0xec   :  { %124 = vst.msk [vmem:[#allocation2 + $0x8] sm:$0xff] %vm48_vm0, %v122_v10 }
  0xef   :  { %v128_v13 = vld [vmem:[#allocation2] sm:$0xff] }
  0xf0   :  { %v137_v14 = vadd.f32 %v163_v12, %v128_v13 }
  0xf2   :  { %139 = vst.msk [vmem:[#allocation8] sm:$0xff] %vm48_vm0, %v137_v14 }
  0xf3   :  { %v129_v15 = vld [vmem:[#allocation2 + $0x8] sm:$0xff] }
  0xf4   :  { %v138_v16 = vadd.f32 %v163_v12, %v129_v15 }
  0xf6   :  { %140 = vst.msk [vmem:[#allocation8 + $0x8] sm:$0xff] %vm48_vm0, %v138_v16 }
  0xf7   :  { %238 = shalt.err (!%p235_p0)
}
  0xf8   :  { %s260_s27 = smov 128   ;;  %s261_s2 = smov 8  }
  0xf9   :  { %152 = dma.vmem_to_hbm [thread:$0]  %s147_s25, 256, %s304_s3, [#allocation5], %s260_s27, %s260_s27, %s261_s2  }
  0xfa   :  { %251 = dma.done.wait [#allocation5], 256  }
  0xfb   :  { %252 = vsyncadd [#allocation5], 4294967040 }
  0xfc   :  { %156 = vsyncpa [#allocation4], 1 }
  0xfd   :  { %157 = vsyncpa [#allocation7], 1 }
  0xfe   :  { %158 = vsyncpa [#allocation5], 1 }

</bundles_post_ra>
